<compile_context>
chip_gen: v7x
topology: tpu7x:2x2x1
jax: 0.10.0
libtpu: 0.0.40
codegen_flags: <defaults>
</compile_context>

<pallas_src>
import functools

import jax
import jax.numpy as jnp
from jax.experimental import pallas as pl
from jax.experimental.pallas import tpu as pltpu

LANE = 128  # channel dims are padded to multiples of the lane width


def _round_up(x, m):
    return ((x + m - 1) // m) * m


def _pad_to(a, shape):
    return jnp.pad(a, [(0, s - d) for d, s in zip(a.shape, shape)])


# ----------------------------------------------------------------------------
# Kernels
# ----------------------------------------------------------------------------
def _aspp_fused_kernel(xp_hbm, w0_ref, s0_ref, b0_ref,
                       wd_ref, sd_ref, bd_ref,
                       wpm_ref, pool_ref, ps_ref, pb_ref,
                       o_ref,
                       strip_ref, dma_sem,
                       *, TH, W, Cin_p, Cout_p, Dmax, rates, NH):
    """Fused ASPP tile: all conv branches + their projection slices + proj BN/ReLU.

    xp_hbm  : (N, H+2D, Wp_pad, Cin_p) bf16  spatially padded activation, HBM (ANY)
    w0_ref  : (Cin_p, Cout_p) bf16           1x1 branch weight
    wd_ref  : (R, 9, Cin_p, Cout_p) bf16     dilated 3x3 weights, per tap
    wpm_ref : (R+1, Cout_p, Cout_p) bf16     projection weight slices (b0 + rates)
    pool_ref: (1, 1, Cout_p) f32             pooling branch, already projected
    s*/b*   : folded BatchNorm scale/bias (f32)
    o_ref   : (1, TH, W, Cout_p) f32         final projected output tile
    """
    n = pl.program_id(0)
    h = pl.program_id(1)
    STRIP = TH + 2 * Dmax
    M = TH * W
    slot = h % 2

    def strip_copy(h_idx, s):
        return pltpu.make_async_copy(
            xp_hbm.at[n, pl.ds(h_idx * TH, STRIP)],
            strip_ref.at[s],
            dma_sem.at[s])

    # Prime the double buffer at the first row-strip of each image.
    @pl.when(h == 0)
    def _():
        strip_copy(0, 0).start()

    # Prefetch the NEXT strip into the other buffer: its DMA is hidden behind
    # this step's full conv/projection compute (not just the 1x1 matmul).
    @pl.when(h + 1 < NH)
    def _():
        strip_copy(h + 1, 1 - slot).start()

    # Wait for this step's strip (issued by the previous step / the prime).
    strip_copy(h, slot).wait()
    strip = strip_ref[slot]                              # (STRIP, Wp_pad, Cin_p)

    def tap(r0, c0):
        return strip[r0:r0 + TH, c0:c0 + W, :].reshape(M, Cin_p)

    # ---- branch 0: 1x1 conv + BN + ReLU, read from the strip centre ----------
    # (the unpadded activation is NOT streamed a second time from HBM)
    x0 = tap(Dmax, Dmax)
    y0 = jnp.dot(x0, w0_ref[...], preferred_element_type=jnp.float32)
    y0 = jnp.maximum(y0 * s0_ref[...] + b0_ref[...], 0.0)
    acc = jnp.dot(y0.astype(jnp.bfloat16), wpm_ref[0],
                  preferred_element_type=jnp.float32)            # (M, Cout_p)

    # ---- pooling branch: per-batch, already-projected row bias ---------------
    # (bilinear upsample of a 1x1 pooled map == broadcast)
    acc = acc + pool_ref[...].reshape(1, Cout_p)

    # ---- dilated 3x3 branches: 9 per-tap MXU dots accumulated in f32 ---------
    # (no (M, 9*Cin) concat slab), then BN + ReLU and the branch's projection.
    for r, d in enumerate(rates):
        off = Dmax - d
        yr = jnp.dot(tap(off, off), wd_ref[r, 0],
                     preferred_element_type=jnp.float32)
        for t in range(1, 9):
            ky, kx = divmod(t, 3)
            yr = yr + jnp.dot(tap(off + ky * d, off + kx * d), wd_ref[r, t],
                              preferred_element_type=jnp.float32)
        yr = jnp.maximum(yr * sd_ref[r] + bd_ref[r], 0.0)
        acc = acc + jnp.dot(yr.astype(jnp.bfloat16), wpm_ref[1 + r],
                            preferred_element_type=jnp.float32)

    # ---- projection BN + ReLU (Dropout(0.5) = identity in eval mode) ---------
    out = jnp.maximum(acc * ps_ref[...] + pb_ref[...], 0.0)
    o_ref[...] = out.reshape(1, TH, W, Cout_p).astype(o_ref.dtype)


def _pool_proj_kernel(x_ref, wp_ref, sp_ref, bp_ref, wproj_ref, o_ref, acc_ref,
                      *, inv_hw):
    """Global avg-pool -> 1x1 conv -> BN -> ReLU -> projection slice.

    Spatially tiled: partial sums accumulate in a (1, Cin_p) f32 scratch; the
    tiny matmuls run once per image at the last spatial tile.
    """
    t = pl.program_id(1)

    @pl.when(t == 0)
    def _():
        acc_ref[...] = jnp.zeros_like(acc_ref)

    # Partial spatial sum in f32 (tiled -> no full-image f32 copy in VMEM).
    acc_ref[...] += jnp.sum(x_ref[...], axis=1, dtype=jnp.float32)

    @pl.when(t == pl.num_programs(1) - 1)
    def _():
        m = acc_ref[...] * inv_hw                                    # (1, Cin_p)
        y = jnp.dot(m.astype(jnp.bfloat16), wp_ref[...],
                    preferred_element_type=jnp.float32)
        y = jnp.maximum(y * sp_ref[...] + bp_ref[...], 0.0)
        pb = jnp.dot(y.astype(jnp.bfloat16), wproj_ref[...],
                     preferred_element_type=jnp.float32)             # (1, Cout_p)
        o_ref[...] = pb.reshape(1, 1, -1)


# ----------------------------------------------------------------------------
# Tiling choices
# ----------------------------------------------------------------------------
def _choose_tile_h(H, W, Cin_p, Cout_p, Dmax, Wp_pad,
                   strip_budget_bytes=24 * 1024 * 1024):
    """Smallest divisor of H reaching M = TH*W >= 1024 under a VMEM budget,
    otherwise the largest divisor that fits (demo shapes -> TH = H)."""
    target_m = 1024
    best = 1
    for th in range(1, H + 1):
        if H % th:
            continue
        strip = 2 * (th + 2 * Dmax) * Wp_pad * Cin_p * 2   # double-buffered bf16
        outb = 2 * th * W * Cout_p * 4                     # double-buffered f32 out
        if strip + outb > strip_budget_bytes:
            continue
        best = th
        if th * W >= target_m:
            break
    return best


def _choose_pool_tile(HWp, Cin_p, budget_bytes=8 * 1024 * 1024):
    """Largest divisor of HWp that is sublane-aligned (or the full extent) and
    whose bf16 block fits the budget."""
    for ts in range(HWp, 0, -1):
        if HWp % ts:
            continue
        if ts * Cin_p * 2 <= budget_bytes and (ts % 8 == 0 or ts == HWp):
            return ts
    return HWp


# ----------------------------------------------------------------------------
# pallas_call wrappers
# ----------------------------------------------------------------------------
def _pool_projection_bias(xp3d, wp, sp, bp, wproj_pool, *, inv_hw):
    N, HWp, Cin_p = xp3d.shape
    Cout_p = wp.shape[1]
    TS = _choose_pool_tile(HWp, Cin_p)
    NT = HWp // TS
    kernel = functools.partial(_pool_proj_kernel, inv_hw=inv_hw)
    return pl.pallas_call(
        kernel,
        grid=(N, NT),
        out_shape=jax.ShapeDtypeStruct((N, 1, Cout_p), jnp.float32),
        in_specs=[
            pl.BlockSpec((1, TS, Cin_p), lambda n, t: (n, t, 0)),
            pl.BlockSpec(wp.shape, lambda n, t: (0, 0)),
            pl.BlockSpec(sp.shape, lambda n, t: (0, 0)),
            pl.BlockSpec(bp.shape, lambda n, t: (0, 0)),
            pl.BlockSpec(wproj_pool.shape, lambda n, t: (0, 0)),
        ],
        out_specs=pl.BlockSpec((1, 1, Cout_p), lambda n, t: (n, 0, 0)),
        scratch_shapes=[pltpu.VMEM((1, Cin_p), jnp.float32)],
        compiler_params=pltpu.CompilerParams(
            dimension_semantics=("parallel", "arbitrary")),
    )(xp3d, wp, sp, bp, wproj_pool)


def _aspp_fused(xp, pool_bias, params, *, TH, Dmax, H, W, single_buffer_weights):
    N = xp.shape[0]
    Cin_p = xp.shape[-1]
    Wp_pad = xp.shape[2]
    Cout_p = params["Cout_p"]
    rates = params["rates"]
    NH = H // TH
    STRIP = TH + 2 * Dmax

    # Grid-invariant weights: single-buffered to avoid doubling their VMEM
    # footprint (matters at production sizes, esp. v7x's 64 MiB VMEM).
    wmode = dict(pipeline_mode=pl.Buffered(1)) if single_buffer_weights else {}

    def wfull(shape):
        nd = len(shape)
        return pl.BlockSpec(shape, lambda n, h, _nd=nd: (0,) * _nd, **wmode)

    kernel = functools.partial(
        _aspp_fused_kernel, TH=TH, W=W, Cin_p=Cin_p, Cout_p=Cout_p,
        Dmax=Dmax, rates=rates, NH=NH)

    return pl.pallas_call(
        kernel,
        grid=(N, NH),
        out_shape=jax.ShapeDtypeStruct((N, H, W, Cout_p), jnp.float32),
        in_specs=[
            pl.BlockSpec(memory_space=pl.ANY),            # shared padded input
            wfull(params["b0_w"].shape),
            wfull(params["b0_scale"].shape),
            wfull(params["b0_bias"].shape),
            wfull(params["d_w"].shape),
            wfull(params["d_scale"].shape),
            wfull(params["d_bias"].shape),
            wfull(params["proj_w_main"].shape),
            pl.BlockSpec((1, 1, Cout_p), lambda n, h: (n, 0, 0)),
            wfull(params["proj_scale"].shape),
            wfull(params["proj_bias"].shape),
        ],
        out_specs=pl.BlockSpec((1, TH, W, Cout_p), lambda n, h: (n, h, 0, 0)),
        scratch_shapes=[
            pltpu.VMEM((2, STRIP, Wp_pad, Cin_p), jnp.bfloat16),  # dbl-buf strip
            pltpu.SemaphoreType.DMA((2,)),
        ],
        compiler_params=pltpu.CompilerParams(
            # batch axis parallel (megacore); row-strip axis carries the
            # double-buffer state -> "arbitrary".
            dimension_semantics=("parallel", "arbitrary"),
            vmem_limit_bytes=48 * 1024 * 1024,   # < v7x's 64 MiB physical
        ),
    )(xp, params["b0_w"], params["b0_scale"], params["b0_bias"],
      params["d_w"], params["d_scale"], params["d_bias"],
      params["proj_w_main"], pool_bias,
      params["proj_scale"], params["proj_bias"])


# ----------------------------------------------------------------------------
# Parameter construction (PyTorch-shaped weights -> kernel-ready, padded, bf16)
# ----------------------------------------------------------------------------
def _fold_bn(gamma, beta, mean, var, eps=1e-5):
    scale = gamma / jnp.sqrt(var + eps)
    bias = beta - mean * scale
    return scale, bias


def make_aspp_params(key, in_channels, atrous_rates, out_channels):
    Cin, Cout = in_channels, out_channels
    Cin_p, Cout_p = _round_up(Cin, LANE), _round_up(Cout, LANE)
    rates = tuple(atrous_rates)
    keys = iter(jax.random.split(key, 64))

    def bf(w):  # bf16 round-trip so kernel and reference use identical weights
        return w.astype(jnp.bfloat16).astype(jnp.float32)

    def bn(c):
        gamma = jax.random.uniform(next(keys), (c,), jnp.float32, 0.5, 1.5)
        beta = jax.random.normal(next(keys), (c,), jnp.float32) * 0.1
        mean = jax.random.normal(next(keys), (c,), jnp.float32) * 0.1
        var = jax.random.uniform(next(keys), (c,), jnp.float32, 0.5, 1.5)
        return _fold_bn(gamma, beta, mean, var)

    p = dict(Cin=Cin, Cout=Cout, Cin_p=Cin_p, Cout_p=Cout_p, rates=rates)
    raw = {}

    # Branch 0: 1x1 conv, PyTorch weight (Cout, Cin, 1, 1) -> (Cin, Cout)
    w0 = bf(jax.random.normal(next(keys), (Cout, Cin, 1, 1), jnp.float32) * 0.1)
    raw["w0"] = jnp.transpose(w0[:, :, 0, 0], (1, 0))
    raw["bn0"] = bn(Cout)
    # Dilated 3x3 branches, PyTorch (Cout, Cin, 3, 3) -> (3, 3, Cin, Cout)
    raw["wd"], raw["bnd"] = [], []
    for _ in rates:
        w = bf(jax.random.normal(next(keys), (Cout, Cin, 3, 3), jnp.float32) * 0.1)
        raw["wd"].append(jnp.transpose(w, (2, 3, 1, 0)))
        raw["bnd"].append(bn(Cout))
    # Pooling branch 1x1 conv
    wp = bf(jax.random.normal(next(keys), (Cout, Cin, 1, 1), jnp.float32) * 0.1)
    raw["wp"] = jnp.transpose(wp[:, :, 0, 0], (1, 0))
    raw["bnp"] = bn(Cout)
    # Projection: (Cout, 5*Cout, 1, 1) -> (5*Cout, Cout)
    nb = len(rates) + 2
    wproj = bf(jax.random.normal(next(keys), (Cout, nb * Cout, 1, 1),
                                 jnp.float32) * 0.1)
    raw["wproj"] = jnp.transpose(wproj[:, :, 0, 0], (1, 0))
    raw["bnproj"] = bn(Cout)
    p["raw"] = raw

    # ---- kernel-ready padded / bf16 forms ------------------------------------
    def pad_sb(sb):
        s, b = sb
        # zero-padded channels stay exactly 0 through BN + ReLU.
        return _pad_to(s, (Cout_p,))[None, :], _pad_to(b, (Cout_p,))[None, :]

    p["b0_w"] = _pad_to(raw["w0"], (Cin_p, Cout_p)).astype(jnp.bfloat16)
    p["b0_scale"], p["b0_bias"] = pad_sb(raw["bn0"])

    wds, sds, bds = [], [], []
    for r in range(len(rates)):
        w9 = raw["wd"][r].reshape(9, Cin, Cout)           # tap index = ky*3 + kx
        wds.append(_pad_to(w9, (9, Cin_p, Cout_p)))
        s, b = pad_sb(raw["bnd"][r])
        sds.append(s)
        bds.append(b)
    p["d_w"] = jnp.stack(wds).astype(jnp.bfloat16)        # (R, 9, Cin_p, Cout_p)
    p["d_scale"] = jnp.stack(sds)
    p["d_bias"] = jnp.stack(bds)

    p["pool_w"] = _pad_to(raw["wp"], (Cin_p, Cout_p)).astype(jnp.bfloat16)
    p["pool_scale"], p["pool_bias"] = pad_sb(raw["bnp"])

    # Projection split per source branch so the concat can be fused away.
    slices = [_pad_to(raw["wproj"][k * Cout:(k + 1) * Cout], (Cout_p, Cout_p))
              for k in range(nb)]
    p["proj_w_main"] = jnp.stack(slices[:-1]).astype(jnp.bfloat16)  # b0 + rates
    p["proj_w_pool"] = slices[-1].astype(jnp.bfloat16)              # pool branch
    p["proj_scale"], p["proj_bias"] = pad_sb(raw["bnproj"])
    return p


# ----------------------------------------------------------------------------
# Full ASPP forward (input/output NCHW, like PyTorch) + pure-JAX reference
# ----------------------------------------------------------------------------
def aspp_forward(x_nchw, params):
    N, Cin, H, W = x_nchw.shape
    assert Cin == params["Cin"]
    Cin_p, Cout_p, Cout = params["Cin_p"], params["Cout_p"], params["Cout"]
    rates = params["rates"]
    Dmax = max(rates)
    Wp_pad = _round_up(W + 2 * Dmax, 8)          # sublane-aligned padded width

    # NHWC, channels zero-padded to a lane multiple, bf16, spatially padded by
    # the max atrous rate. This single array is the only activation copy in HBM
    # and feeds every branch (incl. the 1x1 and pooling ones).
    x = jnp.transpose(x_nchw, (0, 2, 3, 1))
    x = jnp.pad(x, ((0, 0), (0, 0), (0, 0), (0, Cin_p - Cin))).astype(jnp.bfloat16)
    xp = jnp.pad(x, ((0, 0), (Dmax, Dmax), (Dmax, Wp_pad - W - Dmax), (0, 0)))

    TH = _choose_tile_h(H, W, Cin_p, Cout_p, Dmax, Wp_pad)

    # Pooling branch -> already-projected per-batch row bias (N, 1, Cout_p).
    # Summing over the zero-padded spatial extent is exact; divide by H*W.
    HWp = (H + 2 * Dmax) * Wp_pad
    pool_bias = _pool_projection_bias(
        xp.reshape(N, HWp, Cin_p), params["pool_w"], params["pool_scale"],
        params["pool_bias"], params["proj_w_pool"], inv_hw=1.0 / (H * W))

    try:
        out = jax.block_until_ready(
            _aspp_fused(xp, pool_bias, params, TH=TH, Dmax=Dmax, H=H, W=W,
                        single_buffer_weights=True))
    except Exception:
        # pl.Buffered(1) not accepted by this JAX build -> default buffering.
        out = _aspp_fused(xp, pool_bias, params, TH=TH, Dmax=Dmax, H=H, W=W,
                          single_buffer_weights=False)

    out = out[..., :Cout]                        # drop channel padding
    # TODO(synk): emit bf16 / keep NHWC when the consumer allows it, to halve
    # writeback bytes and skip this slice+transpose HBM pass.
    return jnp.transpose(out, (0, 3, 1, 2))      # back to NCHW


def aspp_reference(x_nchw, params):
    """Pure-JAX reference (same bf16-rounded weights/inputs, f32 math)."""
    raw = params["raw"]
    rates = params["rates"]
    x = jnp.transpose(x_nchw, (0, 2, 3, 1)).astype(jnp.bfloat16).astype(jnp.float32)
    N, H, W, _ = x.shape

    def bnrelu(y, sb):
        s, b = sb
        return jnp.maximum(y * s + b, 0.0)

    branches = [bnrelu(jnp.einsum("nhwc,co->nhwo", x, raw["w0"]), raw["bn0"])]
    for r, d in enumerate(rates):
        xpad = jnp.pad(x, ((0, 0), (d, d), (d, d), (0, 0)))
        w = raw["wd"][r]                                   # (3, 3, Cin, Cout)
        acc = jnp.zeros((N, H, W, w.shape[-1]), jnp.float32)
        for ky in range(3):
            for kx in range(3):
                acc = acc + jnp.einsum(
                    "nhwc,co->nhwo",
                    xpad[:, ky * d:ky * d + H, kx * d:kx * d + W, :], w[ky, kx])
        branches.append(bnrelu(acc, raw["bnd"][r]))
    m = jnp.mean(x, axis=(1, 2))                           # (N, Cin)
    pool = bnrelu(m @ raw["wp"], raw["bnp"])               # (N, Cout)
    branches.append(jnp.broadcast_to(pool[:, None, None, :], branches[0].shape))
    cat = jnp.concatenate(branches, axis=-1)               # (N, H, W, 5*Cout)
    y = bnrelu(jnp.einsum("nhwk,ko->nhwo", cat, raw["wproj"]), raw["bnproj"])
    return jnp.transpose(y, (0, 3, 1, 2))


# ----------------------------------------------------------------------------
if __name__ == "__main__":
    key = jax.random.PRNGKey(0)
    k_x, k_p = jax.random.split(key)

    # Small shapes consistent with the module: ASPP(in_channels=4,
    # atrous_rates=(1, 2, 3), out_channels=8) on x of shape (2, 4, 16, 16).
    N, Cin, H, W = 2, 4, 16, 16
    Cout = 8
    rates = (1, 2, 3)

    x = jax.random.normal(k_x, (N, Cin, H, W), jnp.float32)
    params = make_aspp_params(k_p, Cin, rates, Cout)

    out = jax.block_until_ready(aspp_forward(x, params))
    ref = jax.block_until_ready(aspp_reference(x, params))

    assert out.shape == (N, Cout, H, W), out.shape
    assert bool(jnp.all(jnp.isfinite(out)))
    assert bool(jnp.allclose(out, ref, rtol=2e-2, atol=2e-2)), \
        float(jnp.max(jnp.abs(out - ref)))
    print("KERNEL_OK")
</pallas_src>

<mosaic_0001>
module attributes {stable_mosaic.version = 11 : i64} {
  func.func @_pool_proj_kernel(%arg0: i32, %arg1: i32, %arg2: memref<1x528x128xbf16, #tpu.memory_space<vmem>>, %arg3: memref<128x128xbf16, #tpu.memory_space<vmem>>, %arg4: memref<1x128xf32, #tpu.memory_space<vmem>>, %arg5: memref<1x128xf32, #tpu.memory_space<vmem>>, %arg6: memref<128x128xbf16, #tpu.memory_space<vmem>>, %arg7: memref<1x1x128xf32, #tpu.memory_space<vmem>>, %arg8: memref<1x128xf32, #tpu.memory_space<vmem>>) attributes {dimension_semantics = [#tpu.dimension_semantics<parallel>, #tpu.dimension_semantics<arbitrary>], iteration_bounds = array<i64: 2, 1>, scalar_prefetch = 0 : i64, scratch_operands = 1 : i64, tpu.core_type = #tpu.core_type<tc>, window_params = [{transform_indices = @transform_0, window_bounds = array<i64: 1, 528, 128>}, {pipeline_mode = #tpu.pipeline_mode<synchronous>, transform_indices = @transform_1, window_bounds = array<i64: 128, 128>}, {pipeline_mode = #tpu.pipeline_mode<synchronous>, transform_indices = @transform_2, window_bounds = array<i64: 1, 128>}, {pipeline_mode = #tpu.pipeline_mode<synchronous>, transform_indices = @transform_3, window_bounds = array<i64: 1, 128>}, {pipeline_mode = #tpu.pipeline_mode<synchronous>, transform_indices = @transform_4, window_bounds = array<i64: 128, 128>}, {transform_indices = @transform_5, window_bounds = array<i64: 1, 1, 128>}]} {
    %c0_i32 = arith.constant 0 : i32
    %0 = arith.cmpi eq, %arg1, %c0_i32 : i32
    %1 = arith.extui %0 : i1 to i32
    %c0_i32_0 = arith.constant 0 : i32
    %2 = arith.cmpi ne, %1, %c0_i32_0 : i32
    scf.if %2 {
      %cst_9 = arith.constant 0.000000e+00 : f32
      %12 = vector.broadcast %cst_9 : f32 to vector<1x128xf32>
      %c0_10 = arith.constant 0 : index
      %c0_11 = arith.constant 0 : index
      %13 = vector.load %arg8[%c0_10, %c0_11] : memref<1x128xf32, #tpu.memory_space<vmem>>, vector<1x128xf32>
      tpu.vector_store %arg8[%c0_10, %c0_11], %12 {strides = array<i32>} : memref<1x128xf32, #tpu.memory_space<vmem>>, vector<1x128xf32>,
    } else {
    }
    %c0 = arith.constant 0 : index
    %c0_1 = arith.constant 0 : index
    %3 = vector.load %arg8[%c0, %c0_1] : memref<1x128xf32, #tpu.memory_space<vmem>>, vector<1x128xf32>
    %c0_2 = arith.constant 0 : index
    %c0_3 = arith.constant 0 : index
    %c0_4 = arith.constant 0 : index
    %4 = vector.load %arg2[%c0_2, %c0_3, %c0_4] : memref<1x528x128xbf16, #tpu.memory_space<vmem>>, vector<1x528x128xbf16>
    %5 = arith.extf %4 : vector<1x528x128xbf16> to vector<1x528x128xf32>
    %cst = arith.constant dense<0.000000e+00> : vector<1x128xf32>
    %6 = vector.multi_reduction <add>, %5, %cst [1] : vector<1x528x128xf32> to vector<1x128xf32>
    %7 = arith.addf %3, %6 : vector<1x128xf32>
    %c0_5 = arith.constant 0 : index
    %c0_6 = arith.constant 0 : index
    %8 = vector.load %arg8[%c0_5, %c0_6] : memref<1x128xf32, #tpu.memory_space<vmem>>, vector<1x128xf32>
    tpu.vector_store %arg8[%c0_5, %c0_6], %7 {strides = array<i32>} : memref<1x128xf32, #tpu.memory_space<vmem>>, vector<1x128xf32>,
    %c0_i32_7 = arith.constant 0 : i32
    %9 = arith.cmpi eq, %arg1, %c0_i32_7 : i32
    %10 = arith.extui %9 : i1 to i32
    %c0_i32_8 = arith.constant 0 : i32
    %11 = arith.cmpi ne, %10, %c0_i32_8 : i32
    scf.if %11 {
      %c0_9 = arith.constant 0 : index
      %c0_10 = arith.constant 0 : index
      %12 = vector.load %arg8[%c0_9, %c0_10] : memref<1x128xf32, #tpu.memory_space<vmem>>, vector<1x128xf32>
      %cst_11 = arith.constant 3.906250e-03 : f32
      %13 = vector.broadcast %cst_11 : f32 to vector<1x128xf32>
      %14 = arith.mulf %12, %13 : vector<1x128xf32>
      %15 = arith.truncf %14 : vector<1x128xf32> to vector<1x128xbf16>
      %c0_12 = arith.constant 0 : index
      %c0_13 = arith.constant 0 : index
      %16 = vector.load %arg3[%c0_12, %c0_13] : memref<128x128xbf16, #tpu.memory_space<vmem>>, vector<128x128xbf16>
      %cst_14 = arith.constant dense<0.000000e+00> : vector<1x128xf32>
      %17 = tpu.matmul %15, %16, %cst_14 {dimension_numbers = #tpu.dot_dimension_numbers<[1], [0], [0], [1], [0, 0, 1, 1], [], []>} : vector<1x128xbf16>, vector<128x128xbf16>, vector<1x128xf32> -> vector<1x128xf32>
      %c0_15 = arith.constant 0 : index
      %c0_16 = arith.constant 0 : index
      %18 = vector.load %arg4[%c0_15, %c0_16] : memref<1x128xf32, #tpu.memory_space<vmem>>, vector<1x128xf32>
      %19 = arith.mulf %17, %18 : vector<1x128xf32>
      %c0_17 = arith.constant 0 : index
      %c0_18 = arith.constant 0 : index
      %20 = vector.load %arg5[%c0_17, %c0_18] : memref<1x128xf32, #tpu.memory_space<vmem>>, vector<1x128xf32>
      %21 = arith.addf %19, %20 : vector<1x128xf32>
      %cst_19 = arith.constant 0.000000e+00 : f32
      %22 = vector.broadcast %cst_19 : f32 to vector<1x128xf32>
      %23 = arith.maximumf %21, %22 : vector<1x128xf32>
      %24 = arith.truncf %23 : vector<1x128xf32> to vector<1x128xbf16>
      %c0_20 = arith.constant 0 : index
      %c0_21 = arith.constant 0 : index
      %25 = vector.load %arg6[%c0_20, %c0_21] : memref<128x128xbf16, #tpu.memory_space<vmem>>, vector<128x128xbf16>
      %cst_22 = arith.constant dense<0.000000e+00> : vector<1x128xf32>
      %26 = tpu.matmul %24, %25, %cst_22 {dimension_numbers = #tpu.dot_dimension_numbers<[1], [0], [0], [1], [0, 0, 1, 1], [], []>} : vector<1x128xbf16>, vector<128x128xbf16>, vector<1x128xf32> -> vector<1x128xf32>
      %27 = vector.shape_cast %26 : vector<1x128xf32> to vector<1x1x128xf32>
      %c0_23 = arith.constant 0 : index
      %c0_24 = arith.constant 0 : index
      %c0_25 = arith.constant 0 : index
      %28 = vector.load %arg7[%c0_23, %c0_24, %c0_25] : memref<1x1x128xf32, #tpu.memory_space<vmem>>, vector<1x1x128xf32>
      tpu.vector_store %arg7[%c0_23, %c0_24, %c0_25], %27 {strides = array<i32>} : memref<1x1x128xf32, #tpu.memory_space<vmem>>, vector<1x1x128xf32>,
    } else {
    }
    return
  }
  func.func @transform_0(%arg0: i32, %arg1: i32) -> (i32, i32, i32) {
    %c0_i32 = arith.constant 0 : i32
    %c0_i32_0 = arith.constant 0 : i32
    return %arg0, %arg1, %c0_i32 : i32, i32, i32
  }
  func.func @transform_1(%arg0: i32, %arg1: i32) -> (i32, i32) {
    %c0_i32 = arith.constant 0 : i32
    %c0_i32_0 = arith.constant 0 : i32
    %c0_i32_1 = arith.constant 0 : i32
    return %c0_i32, %c0_i32_0 : i32, i32
  }
  func.func @transform_2(%arg0: i32, %arg1: i32) -> (i32, i32) {
    %c0_i32 = arith.constant 0 : i32
    %c0_i32_0 = arith.constant 0 : i32
    %c0_i32_1 = arith.constant 0 : i32
    return %c0_i32, %c0_i32_0 : i32, i32
  }
  func.func @transform_3(%arg0: i32, %arg1: i32) -> (i32, i32) {
    %c0_i32 = arith.constant 0 : i32
    %c0_i32_0 = arith.constant 0 : i32
    %c0_i32_1 = arith.constant 0 : i32
    return %c0_i32, %c0_i32_0 : i32, i32
  }
  func.func @transform_4(%arg0: i32, %arg1: i32) -> (i32, i32) {
    %c0_i32 = arith.constant 0 : i32
    %c0_i32_0 = arith.constant 0 : i32
    %c0_i32_1 = arith.constant 0 : i32
    return %c0_i32, %c0_i32_0 : i32, i32
  }
  func.func @transform_5(%arg0: i32, %arg1: i32) -> (i32, i32, i32) {
    %c0_i32 = arith.constant 0 : i32
    %c0_i32_0 = arith.constant 0 : i32
    %c0_i32_1 = arith.constant 0 : i32
    return %arg0, %c0_i32, %c0_i32_0 : i32, i32, i32
  }
}

</mosaic_0001>

<bundles_post_ra>
// kernel: tpu_custom_call.1
= control target key start
LH: loop header
LB: loop body
LE: loop exit
PB: predicated region body
PF: predicated region fallthrough
CT: control target
= control target key end

     0   :  { %10 = vsyncpa [#allocation4], 0  ;;  %s1720_s0 = inlined_call_operand.hbm [shape: bf16[2,528,128], index: 0, kind: input, shape index: {}]   ;;  %s1721_s1 = inlined_call_operand.hbm [shape: bf16[128,128], index: 1, kind: input, shape index: {}]   ;;  %s1722_s2 = inlined_call_operand.vmem [shape: f32[1,128], index: 2, kind: input, shape index: {}]   ;;  %s1723_s3 = inlined_call_operand.vmem [shape: f32[1,128], index: 3, kind: input, shape index: {}]   ;;  %s1724_s4 = inlined_call_operand.hbm [shape: bf16[128,128], index: 4, kind: input, shape index: {}]   ;;  %s1725_s5 = inlined_call_operand.hbm [shape: f32[2,1,128], index: 5, kind: output, shape index: {}]  }
   0x1   :  { %12 = vsyncpa [#allocation4 + $0x1], 0 }
   0x2   :  { %13 = vsyncpa [#allocation7], 0 }
   0x3   :  { %14 = vsyncpa [#allocation5], 0 }
   0x4   :  { %16 = vsyncpa [#allocation5 + $0x1], 0  ;;  %s1399_s18 = smov 0   ;;  %s1401_s19 = smov 0  }
   0x5   :  { %s1403_s20 = smov 0   ;;  %s1405_s21 = smov 0  }
   0x6   :  { %s1407_s22 = smov 0   ;;  %s1409_s23 = smov 0  }
   0x7 LB: > { %s830_s24 = sadd.s32 4294967295, %s1359_s23   ;;  %s831_s25 = sadd.s32 4294967294, %s1359_s23   ;;  %s1359_s23 = sphi %s1409_s23, %s22_s23   ;;  %s1355_s22 = sphi %s1407_s22, %s1751_s22   ;;  %s1351_s21 = sphi %s1405_s21, %s1750_s21   ;;  %s1347_s20 = sphi %s1403_s20, %s1749_s20   ;;  %s1343_s19 = sphi %s1401_s19, %s1748_s19   ;;  %s1339_s18 = sphi %s1399_s18, %s1747_s18  }
   0x8   : > { %p56_p0 = scmp.ne.s32.totalorder %s1343_s19, %s1339_s18  ;;  %p1433_p1 = scmp.eq.s32.totalorder %s830_s24, 0 }
   0x9   : > { %p1437_p2 = scmp.eq.s32.totalorder %s830_s24, 1  ;;  %p170_p3 = scmp.eq.s32.totalorder %s831_s25, 1 }
   0xa   : > { %s1732_s26 = scalar_select %p1433_p1, 1, 0 }
   0xb   : > { %p1443_p4 = por %p1433_p1, %p56_p0  ;;  %p832_p5 = scmp.ge.s32.totalorder %s1359_s23, 1 }
   0xc   : > { %p1448_p6 = por %p170_p3, %p56_p0  ;;  %p177_p7 = scmp.lt.s32.totalorder %s1359_s23, 3 }
   0xd   : > { %s1734_s28 = scalar_select %p1443_p4, 1, 0 }
   0xe   : > { %s1735_s29 = scalar_select %p1448_p6, 1, 0 }
   0xf   : > { %p1453_p8 = pnand %p832_p5, %p177_p7  ;;  %s1361_s6 = smov [#allocation6]  }
  0x10   : > { %s189_s7 = sshll.u32 %s1361_s6, 4  ;;  %s1362_s9 = smov [#allocation8]   ;;  %s1457_s7 = int_to_ptr.vmem [resolvable:$true] %s189_s7 }
  0x11   : > { %p1096_p9 = pneg %p1453_p8  ;;  %s208_s10 = sshll.u32 %s1362_s9, 4  ;;  %s1468_s10 = int_to_ptr.vmem [resolvable:$true] %s208_s10 }
  0x12   : > { %s1187_s13 = scalar_lea.hbm %s1721_s1, 1024 }
  0x13   : > { %p1464_p11 = pnand %p1096_p9, %p1433_p1  ;;  %p1188_p12 = scmp.ne.s32.totalorder %s1721_s1, %s1187_s13 }
  0x14   : > { %p1194_p5 = scmp.lt.u32.totalorder %s1187_s13, %s1721_s1 }
  0x15   : > { %p1189_p13 = pneg %p1464_p11 }
  0x17   : > { %p1190_p0 = pnand %p1189_p13, %p1188_p12 }
  0x19   : > { %p1191_p3 = pneg %p1190_p0 }
  0x1b   : > { %p1196_p7 = pnand %p1194_p5, %p1191_p3 }
  0x1d   : > { %1199 = shalt.err (!%p1196_p7)
}
  0x1e   : > { %s1200_s24 = scalar_lea.vmem %s1457_s7, 1024  ;;  %p1208_p1 = scmp.lt.s32.totalorder %s1457_s7, %s1457_s7 }
  0x1f   : > { %p1201_p9 = scmp.ne.s32.totalorder %s1457_s7, %s1200_s24  ;;  %p1209_p12 = scmp.lt.s32.totalorder %s1200_s24, %s1200_s24 }
  0x21   : > { %p1203_p10 = pnand %p1201_p9, %p1189_p13  ;;  %p1210_p0 = por %p1209_p12, %p1208_p1 }
  0x23   : > { %p1204_p6 = pneg %p1203_p10 }
  0x25   : > { %p1211_p4 = pnand %p1210_p0, %p1204_p6 }
  0x27   : > { %1214 = shalt.err (!%p1211_p4)
}
  0x28   : > { %s1729_s25 = smov 64   ;;  %s1730_s6 = smov 4  }
  0x29   : > { %1099 = dma.hbm_to_vmem [thread:$0]  (!%p1464_p11), %s1721_s1, 1024, %s1457_s7, [#allocation7], %s1729_s25, %s1729_s25, %s1730_s6  }
  0x2a   : > { %s1215_s14 = scalar_lea.hbm %s1724_s4, 1024 }
  0x2b   : > { %p1216_p1 = scmp.ne.s32.totalorder %s1724_s4, %s1215_s14  ;;  %p1222_p10 = scmp.lt.u32.totalorder %s1215_s14, %s1724_s4 }
  0x2d   : > { %p1218_p4 = pnand %p1216_p1, %p1189_p13 }
  0x2f   : > { %p1219_p6 = pneg %p1218_p4 }
  0x31   : > { %p1224_p3 = pnand %p1222_p10, %p1219_p6 }
  0x33   : > { %1227 = shalt.err (!%p1224_p3)
}
  0x34   : > { %s1228_s7 = scalar_lea.vmem %s1468_s10, 1024  ;;  %p1236_p12 = scmp.lt.s32.totalorder %s1468_s10, %s1468_s10 }
  0x35   : > { %p1229_p5 = scmp.ne.s32.totalorder %s1468_s10, %s1228_s7  ;;  %p1237_p0 = scmp.lt.s32.totalorder %s1228_s7, %s1228_s7 }
  0x37   : > { %p1231_p7 = pnand %p1229_p5, %p1189_p13  ;;  %p1238_p1 = por %p1237_p0, %p1236_p12 }
  0x39   : > { %p1232_p9 = pneg %p1231_p7 }
  0x3b   : > { %p1239_p4 = pnand %p1238_p1, %p1232_p9 }
  0x3d   : > { %1242 = shalt.err (!%p1239_p4)
}
  0x3e   : > { %1102 = dma.hbm_to_vmem [thread:$0]  (!%p1464_p11), %s1724_s4, 1024, %s1468_s10, [#allocation7], %s1729_s25, %s1729_s25, %s1730_s6  }
  0x3f   : > { %s34_s8 = sadd.s32 1, %s1355_s22  ;;  %s43_s12 = sadd.s32 1, %s1347_s20 }
  0x40   : > { %p36_p13 = scmp.ge.s32.totalorder %s34_s8, 2  ;;  %p50_p6 = scmp.ne.s32.totalorder %s1347_s20, %s1343_s19 }
  0x41   : > { %p51_p10 = scmp.eq.s32.totalorder %s1359_s23, 0  ;;  %p1113_p3 = scmp.lt.s32.totalorder %s1359_s23, 2 }
  0x42   : > { %s1753_s8 = smov (%p36_p13, %s34_s8), 0  ;;  %p1538_p7 = por %p1437_p2, %p50_p6 }
  0x43   : > { %p52_p5 = por %p51_p10, %p50_p6  ;;  %s38_s14 = ssub.s32 %s1355_s22, %s1753_s8 }
  0x44   : > { %s1738_s13 = scalar_select %p1538_p7, 1, 0 }
  0x45   : > { %s222_s15 = sand.u32 1, %s1347_s20   ;;  %p41_p9 = scmp.eq.s32.totalorder %s38_s14, 0 }
  0x46   : > { %s1081_s10 = smul.u32 264, %s222_s15  ;;  %p1545_p11 = pnand %p1113_p3, %p52_p5 }
  0x47   : > { %s1550_s17 = scalar_select %p41_p9, %s1347_s20, %s43_s12  }
  0x48   : > { %s1082_s24 = smul.u32 4224, %s1355_s22  ;;  %s226_s7 = scalar_lea.vmem [#allocation3], %s1081_s10 }
  0x49   : > { %s235_s9 = sshll.u32 %s226_s7, 4  ;;  %s1560_s14 = scalar_lea.sflag [#allocation4], %s222_s15  ;;  %s1558_s9 = int_to_ptr.vmem [resolvable:$true] %s235_s9 }
  0x4a   : > { %s1556_s25 = scalar_lea.hbm %s1720_s0, %s1082_s24  ;;  %p1245_p12 = pneg %p1545_p11 }
  0x4b   : > { %s1243_s6 = scalar_lea.hbm %s1556_s25, 4224  ;;  %s1248_s24 = scalar_lea.hbm %s1720_s0, 8448 }
  0x4c   : > { %p1244_p2 = scmp.ne.s32.totalorder %s1556_s25, %s1243_s6  ;;  %p1249_p4 = scmp.lt.u32.totalorder %s1556_s25, %s1720_s0 }
  0x4d   : > { %p1250_p13 = scmp.lt.u32.totalorder %s1248_s24, %s1243_s6  ;;  %p1252_p10 = scmp.lt.u32.totalorder %s1243_s6, %s1556_s25 }
  0x4e   : > { %p1246_p0 = pnand %p1245_p12, %p1244_p2 }
  0x4f   : > { %p1251_p6 = por %p1250_p13, %p1249_p4 }
  0x50   : > { %p1247_p1 = pneg %p1246_p0 }
  0x51   : > { %p1253_p3 = por %p1252_p10, %p1251_p6 }
  0x53   : > { %p1254_p5 = pnand %p1253_p3, %p1247_p1 }
  0x55   : > { %1257 = shalt.err (!%p1254_p5)
}
  0x56   : > { %s1258_s15 = scalar_lea.vmem %s1558_s9, 4224  ;;  %s1365_s11 = smov [#allocation3]  }
  0x57   : > { %p1259_p9 = scmp.ne.s32.totalorder %s1558_s9, %s1258_s15  ;;  %s1263_s12 = sshll.u32 %s1365_s11, 4  ;;  %s1264_s12 = int_to_ptr.vmem [resolvable:$false] %s1263_s12 }
  0x58   : > { %s1265_s10 = scalar_lea.vmem %s1264_s12, 8448  ;;  %p1266_p7 = scmp.lt.s32.totalorder %s1558_s9, %s1264_s12 }
  0x59   : > { %p1261_p2 = pnand %p1259_p9, %p1245_p12  ;;  %p1267_p4 = scmp.lt.s32.totalorder %s1265_s10, %s1258_s15 }
  0x5b   : > { %p1262_p0 = pneg %p1261_p2  ;;  %p1268_p13 = por %p1267_p4, %p1266_p7 }
  0x5d   : > { %p1269_p6 = pnand %p1268_p13, %p1262_p0 }
  0x5f   : > { %1272 = shalt.err (!%p1269_p6)
}
  0x60   : > { %s1740_s6 = smov 4   ;;  %s1741_s24 = smov 64  }
  0x61   : > { %1106 = dma.hbm_to_vmem [thread:$0]  (!%p1545_p11), %s1556_s25, 4224, %s1558_s9, %s1560_s14, %s1741_s24, %s1741_s24, %s1740_s6  }
  0x62   : > { %247 = sbr.rel (%p1453_p8) target bundleno = 717 (0x2cd), region = 40  ;;  %s1594_s7 = sand.u32 (!%p1453_p8), 1, %s1343_s19  }
  0x63   : > { %s1083_s27 = smul.u32 (!%p1453_p8), 264, %s1594_s7  ;;  %s250_s15 = scalar_lea.sflag (!%p1453_p8), [#allocation4], %s1594_s7 }
  0x64   : > { %p1742_p7 = scmp.ne.s32.totalorder (!%p1453_p8), %s1734_s28, 0 }
  0x65   : > { %s1598_s11 = scalar_lea.vmem (!%p1453_p8), [#allocation3], %s1083_s27 }
  0x69   : > { %1326 = dma.done.wait (%p1742_p7), %s250_s15, 4224  }
  0x6a   : > { %1328 = vsyncadd (%p1742_p7), %s250_s15, 4294963072  ;;  %p1743_p11 = scmp.ne.s32.totalorder %s1732_s26, 0 }
  0x6c   : > { %1330 = dma.done.wait (%p1743_p11), [#allocation7], 2048  }
  0x6d   : > { %1332 = vsyncadd (%p1743_p11), [#allocation7], 4294965248  ;;  %v1366_v0 = vmov 0.0   ;;  %vm1367_vm0 = vmmov 0   ;;  %v1171_v1 = vld [vmem:[#allocation6] sm:$0xff]   ;;  %v1172_v2 = vld [vmem:[#allocation6 + $0x8] sm:$0xff]  }
  0x6e   : > { %1041 = vmatprep.subr.bf16.mxu0 %v1366_v0  ;;  %293 = vst [vmem:[#allocation2] sm:$0x1] %v1366_v0  ;;  %1057 = vmatprep.mubr.msk.bf16.mxu0 %vm1367_vm0, %v1366_v0  ;;  %v1173_v3 = vld [vmem:[#allocation6 + $0x10] sm:$0xff]   ;;  %v1174_v4 = vld [vmem:[#allocation6 + $0x18] sm:$0xff]   ;;  %v1175_v5 = vld [vmem:[#allocation6 + $0x20] sm:$0xff]   ;;  %s286_s16 = scalar_lea.vmem [#allocation9], %s1594_s7 }
  0x6f   : > { %1061 = vmatprep.subr.bf16.mxu1 %v1366_v0  ;;  %1077 = vmatprep.mubr.msk.bf16.mxu1 %vm1367_vm0, %v1366_v0  ;;  %v1176_v6 = vld [vmem:[#allocation6 + $0x28] sm:$0xff]   ;;  %v860_v7 = vld [vmem:[%s1598_s11] sm:$0xff]   ;;  %v991_v8 = vld [vmem:[%s1598_s11 + $0x8] sm:$0xff]   ;;  %s734_s9 = sshll.u32 %s286_s16, 4  ;;  %s856_s14 = sshll.u32 %s1351_s21, 4  ;;  %s1668_s9 = int_to_ptr.vmem [resolvable:$true] %s734_s9 }
  0x70   : > { %1042 = vmatpush3.bf16.msra.mxu0 %v1171_v1  ;;  %v1177_v9 = vld [vmem:[#allocation6 + $0x30] sm:$0xff]   ;;  %v861_v10 = vunpack.c.l.bf16 %v860_v7  ;;  %v862_v11 = vunpack.c.h.bf16 %v860_v7  ;;  %v865_v12 = vunpack.c.l.bf16 %v991_v8  ;;  %v992_v13 = vld [vmem:[%s1598_s11 + $0x10] sm:$0xff]   ;;  %v866_v14 = vunpack.c.h.bf16 %v991_v8  ;;  %v1178_v16 = vld [vmem:[#allocation6 + $0x38] sm:$0xff]   ;;  %s1673_s6 = scalar_lea.hbm %s1725_s5, %s856_s14  ;;  %s722_s24 = scalar_lea.sflag [#allocation5], %s1594_s7 }
  0x71   : > { %1043 = vmatprep.subr.bf16.mxu0 %v1366_v0  ;;  %v869_v17 = vunpack.c.l.bf16 %v992_v13  ;;  %v993_v19 = vld [vmem:[%s1598_s11 + $0x18] sm:$0xff]   ;;  %v870_v20 = vunpack.c.h.bf16 %v992_v13  ;;  %v994_v24 = vld [vmem:[%s1598_s11 + $0x20] sm:$0xff]   ;;  %v995_v29 = vld [vmem:[%s1598_s11 + $0x28] sm:$0xff]   ;;  %s1273_s27 = scalar_lea.vmem %s1668_s9, 16  ;;  %p1744_p12 = scmp.ne.s32.totalorder %s1738_s13, 0 }
  0x72   : > { %v427_v15 = vadd.f32 %v862_v11, %v861_v10  ;;  %v873_v22 = vunpack.c.l.bf16 %v993_v19  ;;  %v874_v25 = vunpack.c.h.bf16 %v993_v19  ;;  %v877_v27 = vunpack.c.l.bf16 %v994_v24  ;;  %v996_v34 = vld [vmem:[%s1598_s11 + $0x30] sm:$0xff]   ;;  %v997_v39 = vld [vmem:[%s1598_s11 + $0x38] sm:$0xff]   ;;  %v998_v44 = vld [vmem:[%s1598_s11 + $0x40] sm:$0xff]   ;;  %p1274_p8 = scmp.ne.s32.totalorder %s1668_s9, %s1273_s27  ;;  %s1368_s21 = smov [#allocation9]  }
  0x73   : > { %v878_v30 = vunpack.c.h.bf16 %v994_v24  ;;  %v881_v32 = vunpack.c.l.bf16 %v995_v29  ;;  %v882_v35 = vunpack.c.h.bf16 %v995_v29  ;;  %v885_v37 = vunpack.c.l.bf16 %v996_v34  ;;  %v999_v49 = vld [vmem:[%s1598_s11 + $0x48] sm:$0xff]   ;;  %v1180_v55 = vld [vmem:[#allocation8 + $0x8] sm:$0xff]   ;;  %v1181_v61 = vld [vmem:[#allocation8 + $0x10] sm:$0xff]   ;;  %s1277_s15 = sshll.u32 %s1368_s21, 4  ;;  %s1278_s15 = int_to_ptr.vmem [resolvable:$false] %s1277_s15 }
  0x74   : > { %1044 = vmatpush3.bf16.msra.mxu0 %v1172_v2  ;;  %v428_v18 = vadd.f32 %v865_v12, %v427_v15  ;;  %v886_v40 = vunpack.c.h.bf16 %v996_v34  ;;  %v889_v42 = vunpack.c.l.bf16 %v997_v39  ;;  %v890_v45 = vunpack.c.h.bf16 %v997_v39  ;;  %v1179_v52 = vld [vmem:[#allocation8] sm:$0xff]   ;;  %v1001_v62 = vld [vmem:[%s1598_s11 + $0x58] sm:$0xff]   ;;  %p1275_p1 = pnand %p1274_p8, %p1744_p12  ;;  %p1280_p3 = scmp.lt.s32.totalorder %s1668_s9, %s1278_s15 }
  0x75   : > { %1045 = vmatprep.subr.bf16.mxu0 %v1366_v0  ;;  %v893_v47 = vunpack.c.l.bf16 %v998_v44  ;;  %v894_v50 = vunpack.c.h.bf16 %v998_v44  ;;  %v897_v53 = vunpack.c.l.bf16 %v999_v49  ;;  %1062 = vmatpush3.bf16.msra.mxu1 %v1179_v52  ;;  %v1000_v56 = vld [vmem:[%s1598_s11 + $0x50] sm:$0xff]   ;;  %v898_v57 = vunpack.c.h.bf16 %v999_v49  ;;  %v1003_v11 = vld [vmem:[%s1598_s11 + $0x68] sm:$0xff]  }
  0x76   : > { %v429_v21 = vadd.f32 %v866_v14, %v428_v18  ;;  %1063 = vmatprep.subr.bf16.mxu1 %v1366_v0  ;;  %v901_v59 = vunpack.c.l.bf16 %v1000_v56  ;;  %v902_v63 = vunpack.c.h.bf16 %v1000_v56  ;;  %v905_v2 = vunpack.c.l.bf16 %v1001_v62  ;;  %v1183_v10 = vld [vmem:[#allocation8 + $0x20] sm:$0xff]   ;;  %p1276_p10 = pneg %p1275_p1 }
  0x77   : > { %v913_v14 = vunpack.c.l.bf16 %v1003_v11  ;;  %v914_v18 = vunpack.c.h.bf16 %v1003_v11  ;;  %v1011_v52 = vld [vmem:[%s1598_s11 + $0xa8] sm:$0xff]  }
  0x78   : > { %1046 = vmatpush3.bf16.msra.mxu0 %v1173_v3  ;;  %v430_v23 = vadd.f32 %v869_v17, %v429_v21  ;;  %v1004_v17 = vld [vmem:[%s1598_s11 + $0x70] sm:$0xff]  }
  0x79   : > { %1047 = vmatprep.subr.bf16.mxu0 %v1366_v0  ;;  %1064 = vmatpush3.bf16.msra.mxu1 %v1180_v55  ;;  %v945_v55 = vunpack.c.l.bf16 %v1011_v52 }
  0x7a   : > { %v431_v26 = vadd.f32 %v870_v20, %v430_v23  ;;  %1065 = vmatprep.subr.bf16.mxu1 %v1366_v0  ;;  %v917_v20 = vunpack.c.l.bf16 %v1004_v17  ;;  %v918_v23 = vunpack.c.h.bf16 %v1004_v17 }
  0x7c   : > { %1048 = vmatpush3.bf16.msra.mxu0 %v1174_v4  ;;  %v432_v28 = vadd.f32 %v873_v22, %v431_v26  ;;  %v1182_v4 = vld [vmem:[#allocation8 + $0x18] sm:$0xff]   ;;  %v1005_v22 = vld [vmem:[%s1598_s11 + $0x78] sm:$0xff]  }
  0x7d   : > { %1049 = vmatprep.subr.bf16.mxu0 %v1366_v0  ;;  %1066 = vmatpush3.bf16.msra.mxu1 %v1181_v61 }
  0x7e   : > { %v433_v31 = vadd.f32 %v874_v25, %v432_v28  ;;  %1067 = vmatprep.subr.bf16.mxu1 %v1366_v0  ;;  %v921_v25 = vunpack.c.l.bf16 %v1005_v22  ;;  %v922_v28 = vunpack.c.h.bf16 %v1005_v22 }
  0x80   : > { %1050 = vmatpush3.bf16.msra.mxu0 %v1175_v5  ;;  %v434_v33 = vadd.f32 %v877_v27, %v433_v31  ;;  %v1002_v5 = vld [vmem:[%s1598_s11 + $0x60] sm:$0xff]  }
  0x81   : > { %1051 = vmatprep.subr.bf16.mxu0 %v1366_v0  ;;  %v909_v8 = vunpack.c.l.bf16 %v1002_v5  ;;  %1068 = vmatpush3.bf16.msra.mxu1 %v1182_v4  ;;  %v910_v12 = vunpack.c.h.bf16 %v1002_v5  ;;  %v1006_v27 = vld [vmem:[%s1598_s11 + $0x80] sm:$0xff]  }
  0x82   : > { %v435_v36 = vadd.f32 %v878_v30, %v434_v33  ;;  %1069 = vmatprep.subr.bf16.mxu1 %v1366_v0  ;;  %v925_v30 = vunpack.c.l.bf16 %v1006_v27  ;;  %v926_v33 = vunpack.c.h.bf16 %v1006_v27  ;;  %v1014_v4 = vld [vmem:[%s1598_s11 + $0xc0] sm:$0xff]  }
  0x84   : > { %1052 = vmatpush3.bf16.msra.mxu0 %v1176_v6  ;;  %v436_v38 = vadd.f32 %v881_v32, %v435_v36  ;;  %v906_v6 = vunpack.c.h.bf16 %v1001_v62  ;;  %v1007_v32 = vld [vmem:[%s1598_s11 + $0x88] sm:$0xff]   ;;  %v1013_v62 = vld [vmem:[%s1598_s11 + $0xb8] sm:$0xff]  }
  0x85   : > { %1053 = vmatprep.subr.bf16.mxu0 %v1366_v0  ;;  %1070 = vmatpush3.bf16.msra.mxu1 %v1183_v10  ;;  %v954_v5 = vunpack.c.h.bf16 %v1013_v62  ;;  %v958_v10 = vunpack.c.h.bf16 %v1014_v4 }
  0x86   : > { %v437_v41 = vadd.f32 %v882_v35, %v436_v38  ;;  %1071 = vmatprep.subr.bf16.mxu1 %v1366_v0  ;;  %v929_v35 = vunpack.c.l.bf16 %v1007_v32  ;;  %v930_v38 = vunpack.c.h.bf16 %v1007_v32 }
  0x88   : > { %1054 = vmatpush3.bf16.msra.mxu0 %v1177_v9  ;;  %v438_v43 = vadd.f32 %v885_v37, %v437_v41  ;;  %v1008_v37 = vld [vmem:[%s1598_s11 + $0x90] sm:$0xff]  }
  0x89   : > { %1055 = vmatprep.subr.bf16.mxu0 %v1366_v0 }
  0x8a   : > { %v439_v46 = vadd.f32 %v886_v40, %v438_v43  ;;  %v933_v40 = vunpack.c.l.bf16 %v1008_v37  ;;  %v934_v43 = vunpack.c.h.bf16 %v1008_v37 }
  0x8c   : > { %1056 = vmatpush3.bf16.msra.mxu0 %v1178_v16  ;;  %v440_v48 = vadd.f32 %v889_v42, %v439_v46  ;;  %v1184_v16 = vld [vmem:[#allocation8 + $0x28] sm:$0xff]  }
  0x8d   : > { %1072 = vmatpush3.bf16.msra.mxu1 %v1184_v16  ;;  %v1009_v42 = vld [vmem:[%s1598_s11 + $0x98] sm:$0xff]  }
  0x8e   : > { %v441_v51 = vadd.f32 %v890_v45, %v440_v48  ;;  %1073 = vmatprep.subr.bf16.mxu1 %v1366_v0  ;;  %v937_v45 = vunpack.c.l.bf16 %v1009_v42  ;;  %v938_v48 = vunpack.c.h.bf16 %v1009_v42 }
  0x90   : > { %v442_v54 = vadd.f32 %v893_v47, %v441_v51  ;;  %v1010_v47 = vld [vmem:[%s1598_s11 + $0xa0] sm:$0xff]  }
  0x92   : > { %v443_v58 = vadd.f32 %v894_v50, %v442_v54  ;;  %v941_v50 = vunpack.c.l.bf16 %v1010_v47 }
  0x94   : > { %v444_v60 = vadd.f32 %v897_v53, %v443_v58  ;;  %v942_v53 = vunpack.c.h.bf16 %v1010_v47  ;;  %v946_v58 = vunpack.c.h.bf16 %v1011_v52 }
  0x96   : > { %v445_v1 = vadd.f32 %v898_v57, %v444_v60  ;;  %v1012_v57 = vld [vmem:[%s1598_s11 + $0xb0] sm:$0xff]  }
  0x97   : > { %v949_v60 = vunpack.c.l.bf16 %v1012_v57 }
  0x98   : > { %v446_v3 = vadd.f32 %v901_v59, %v445_v1 }
  0x9a   : > { %v447_v7 = vadd.f32 %v902_v63, %v446_v3  ;;  %v950_v63 = vunpack.c.h.bf16 %v1012_v57 }
  0x9c   : > { %v448_v9 = vadd.f32 %v905_v2, %v447_v7  ;;  %v953_v2 = vunpack.c.l.bf16 %v1013_v62  ;;  %v957_v7 = vunpack.c.l.bf16 %v1014_v4 }
  0x9e   : > { %v449_v13 = vadd.f32 %v906_v6, %v448_v9  ;;  %v1015_v9 = vld [vmem:[%s1598_s11 + $0xc8] sm:$0xff]  }
  0xa0   : > { %v450_v15 = vadd.f32 %v909_v8, %v449_v13 }
  0xa2   : > { %v451_v19 = vadd.f32 %v910_v12, %v450_v15  ;;  %v961_v12 = vunpack.c.l.bf16 %v1015_v9  ;;  %v962_v15 = vunpack.c.h.bf16 %v1015_v9 }
  0xa4   : > { %v452_v21 = vadd.f32 %v913_v14, %v451_v19  ;;  %v1016_v14 = vld [vmem:[%s1598_s11 + $0xd0] sm:$0xff]   ;;  %v1017_v19 = vld [vmem:[%s1598_s11 + $0xd8] sm:$0xff]  }
  0xa5   : > { %v965_v17 = vunpack.c.l.bf16 %v1016_v14  ;;  %v969_v22 = vunpack.c.l.bf16 %v1017_v19 }
  0xa6   : > { %v453_v24 = vadd.f32 %v914_v18, %v452_v21 }
  0xa8   : > { %v454_v26 = vadd.f32 %v917_v20, %v453_v24  ;;  %v966_v20 = vunpack.c.h.bf16 %v1016_v14  ;;  %v1018_v24 = vld [vmem:[%s1598_s11 + $0xe0] sm:$0xff]  }
  0xa9   : > { %v973_v27 = vunpack.c.l.bf16 %v1018_v24 }
  0xaa   : > { %v455_v29 = vadd.f32 %v918_v23, %v454_v26 }
  0xac   : > { %v456_v31 = vadd.f32 %v921_v25, %v455_v29  ;;  %v970_v25 = vunpack.c.h.bf16 %v1017_v19  ;;  %v1019_v29 = vld [vmem:[%s1598_s11 + $0xe8] sm:$0xff]  }
  0xad   : > { %v977_v32 = vunpack.c.l.bf16 %v1019_v29 }
  0xae   : > { %v457_v34 = vadd.f32 %v922_v28, %v456_v31 }
  0xb0   : > { %v458_v36 = vadd.f32 %v925_v30, %v457_v34  ;;  %v974_v30 = vunpack.c.h.bf16 %v1018_v24  ;;  %v1020_v34 = vld [vmem:[%s1598_s11 + $0xf0] sm:$0xff]  }
  0xb1   : > { %v981_v37 = vunpack.c.l.bf16 %v1020_v34 }
  0xb2   : > { %v459_v39 = vadd.f32 %v926_v33, %v458_v36 }
  0xb4   : > { %v460_v41 = vadd.f32 %v929_v35, %v459_v39  ;;  %v978_v35 = vunpack.c.h.bf16 %v1019_v29  ;;  %v1021_v39 = vld [vmem:[%s1598_s11 + $0xf8] sm:$0xff]  }
  0xb5   : > { %v985_v42 = vunpack.c.l.bf16 %v1021_v39 }
  0xb6   : > { %v461_v44 = vadd.f32 %v930_v38, %v460_v41 }
  0xb8   : > { %v462_v46 = vadd.f32 %v933_v40, %v461_v44  ;;  %v982_v40 = vunpack.c.h.bf16 %v1020_v34  ;;  %v1022_v44 = vld [vmem:[%s1598_s11 + $0x100] sm:$0xff]   ;;  %s1279_s11 = scalar_lea.vmem %s1278_s15, 32 }
  0xb9   : > { %v989_v47 = vunpack.c.l.bf16 %v1022_v44  ;;  %p1281_p5 = scmp.lt.s32.totalorder %s1279_s11, %s1273_s27 }
  0xba   : > { %v463_v49 = vadd.f32 %v934_v43, %v462_v46 }
  0xbb   : > { %p1282_p9 = por %p1281_p5, %p1280_p3 }
  0xbc   : > { %v464_v51 = vadd.f32 %v937_v45, %v463_v49  ;;  %v986_v45 = vunpack.c.h.bf16 %v1021_v39  ;;  %v990_v49 = vunpack.c.h.bf16 %v1022_v44 }
  0xbd   : > { %p1283_p2 = pnand %p1282_p9, %p1276_p10 }
  0xbe   : > { %v465_v54 = vadd.f32 %v938_v48, %v464_v51 }
  0xc0   : > { %v466_v56 = vadd.f32 %v941_v50, %v465_v54 }
  0xc2   : > { %v467_v59 = vadd.f32 %v942_v53, %v466_v56 }
  0xc4   : > { %v468_v61 = vadd.f32 %v945_v55, %v467_v59 }
  0xc6   : > { %v469_v1 = vadd.f32 %v946_v58, %v468_v61  ;;  %v294_v58 = vld [vmem:[#allocation2] sm:$0x1] }
  0xc8   : > { %v470_v3 = vadd.f32 %v949_v60, %v469_v1  ;;  %v1185_v1 = vld [vmem:[#allocation8 + $0x30] sm:$0xff]  }
  0xc9   : > { %1074 = vmatpush3.bf16.msra.mxu1 %v1185_v1 }
  0xca   : > { %v471_v6 = vadd.f32 %v950_v63, %v470_v3  ;;  %1075 = vmatprep.subr.bf16.mxu1 %v1366_v0  ;;  %v610_v3 = vld [vmem:[%s1722_s2] sm:$0x1] }
  0xcc   : > { %v472_v8 = vadd.f32 %v953_v2, %v471_v6  ;;  %v1186_v2 = vld [vmem:[#allocation8 + $0x38] sm:$0xff]  }
  0xcd   : > { %1076 = vmatpush3.bf16.msra.mxu1 %v1186_v2 }
  0xce   : > { %v473_v11 = vadd.f32 %v954_v5, %v472_v8  ;;  %v612_v5 = vld [vmem:[%s1723_s3] sm:$0x1] }
  0xd0   : > { %v474_v13 = vadd.f32 %v957_v7, %v473_v11 }
  0xd2   : > { %v475_v16 = vadd.f32 %v958_v10, %v474_v13 }
  0xd4   : > { %v476_v18 = vadd.f32 %v961_v12, %v475_v16 }
  0xd6   : > { %v477_v21 = vadd.f32 %v962_v15, %v476_v18 }
  0xd8   : > { %v478_v23 = vadd.f32 %v965_v17, %v477_v21 }
  0xda   : > { %v479_v26 = vadd.f32 %v966_v20, %v478_v23 }
  0xdc   : > { %v480_v28 = vadd.f32 %v969_v22, %v479_v26 }
  0xde   : > { %v481_v31 = vadd.f32 %v970_v25, %v480_v28 }
  0xe0   : > { %v482_v33 = vadd.f32 %v973_v27, %v481_v31 }
  0xe2   : > { %v483_v36 = vadd.f32 %v974_v30, %v482_v33 }
  0xe4   : > { %v484_v38 = vadd.f32 %v977_v32, %v483_v36 }
  0xe6   : > { %v485_v41 = vadd.f32 %v978_v35, %v484_v38 }
  0xe8   : > { %v486_v43 = vadd.f32 %v981_v37, %v485_v41 }
  0xea   : > { %v487_v46 = vadd.f32 %v982_v40, %v486_v43 }
  0xec   : > { %v488_v48 = vadd.f32 %v985_v42, %v487_v46 }
  0xee   : > { %v489_v50 = vadd.f32 %v986_v45, %v488_v48 }
  0xf0   : > { %v490_v51 = vadd.f32 %v989_v47, %v489_v50 }
  0xf2   : > { %v491_v52 = vadd.f32 %v990_v49, %v490_v51 }
  0xf4   : > { %v492_v53 = vrot.slane %v491_v52, 4 }
  0xf6   : > { %v493_v54 = vadd.f32 %v492_v53, %v491_v52 }
  0xf8   : > { %v494_v55 = vrot.slane %v493_v54, 2 }
  0xfa   : > { %v495_v56 = vadd.f32 %v494_v55, %v493_v54 }
  0xfc   : > { %v496_v57 = vrot.slane %v495_v56, 1 }
  0xfe   : > { %v497_v59 = vadd.f32 %v496_v57, %v495_v56 }
 0x100   : > { %v498_v60 = vadd.f32 %v497_v59, %v294_v58 }
 0x102   : > { %499 = vst [vmem:[#allocation2] sm:$0x1] %v498_v60 }
 0x109   : > { %v503_v61 = vld [vmem:[#allocation2] sm:$0x1] }
 0x10a   : > { %v504_v62 = vmul.f32 0.00390625, %v503_v61 }
 0x10c   : > { %v505_v63 = vpack.c.bf16 %v504_v62, %v504_v62 }
 0x10e   : > { %1058 = vmatmul.mubr.bf16.vlgmr.msra.gmra.mrb[0].mxu0 %v505_v63 }
 0x1e1   : > { %v604_v4 = vpop.f32.mrb[0].mxu0 }
 0x1e2   : > { %v611_v6 = vmul.f32 %v610_v3, %v604_v4  ;;  %v1059_v7 = vpop.f32.mrb[1].mxu0 }
 0x1e3   : > { %v607_v8 = vpop.f32.mrb[2].mxu0 }
 0x1e4   : > { %v613_v9 = vadd.f32 %v612_v5, %v611_v6  ;;  %v1060_v10 = vpop.f32.mrb[3].mxu0 }
 0x1e6   : > { %v614_v0 = vmax.f32 %v613_v9, 0.0 }
 0x1e8   : > { %v615_v11 = vpack.c.bf16 %v614_v0, %v614_v0 }
 0x1ea   : > { %1078 = vmatmul.mubr.bf16.vlgmr.msra.gmra.mrb[0].mxu1 %v615_v11 }
 0x2bd   : > { %v714_v12 = vpop.f32.mrb[0].mxu1 }
 0x2be   : > { %720 = vst [vmem:[%s286_s16] sm:$0x1] %v714_v12  ;;  %v1079_v13 = vpop.f32.mrb[1].mxu1 }
 0x2bf   : > { %v717_v14 = vpop.f32.mrb[2].mxu1 }
 0x2c0   : > { %1286 = shalt.err (!%p1283_p2)
}
 0x2c1   : > { %s1287_s7 = scalar_lea.hbm %s1673_s6, 16  ;;  %s1291_s30 = scalar_lea.hbm %s1725_s5, 32 }
 0x2c2   : > { %p1288_p0 = scmp.ne.s32.totalorder %s1673_s6, %s1287_s7  ;;  %p1292_p6 = scmp.lt.u32.totalorder %s1673_s6, %s1725_s5 }
 0x2c3   : > { %p1293_p7 = scmp.lt.u32.totalorder %s1291_s30, %s1287_s7  ;;  %p1295_p8 = scmp.lt.u32.totalorder %s1287_s7, %s1673_s6 }
 0x2c4   : > { %p1289_p4 = pnand %p1288_p0, %p1744_p12 }
 0x2c5   : > { %p1294_p11 = por %p1293_p7, %p1292_p6 }
 0x2c6   : > { %p1290_p13 = pneg %p1289_p4 }
 0x2c7   : > { %p1296_p1 = por %p1295_p8, %p1294_p11 }
 0x2c9   : > { %p1297_p10 = pnand %p1296_p1, %p1290_p13 }
 0x2cb   : > { %1300 = shalt.err (!%p1297_p10)
}
 0x2cc   : > { %1094 = dma.vmem_to_hbm [thread:$0]  (%p1744_p12), %s1668_s9, 16, %s1673_s6, %s722_s24   ;;  %v1080_v15 = vpop.f32.mrb[3].mxu1 }
 0x2cd PF: > { %s746_s14 = sand.u32 1, %s1339_s18   ;;  %p1745_p3 = scmp.ne.s32.totalorder %s1735_s29, 0 }
 0x2ce   : > { %p1746_p5 = scmp.ge.s32.totalorder %s1359_s23, 2  ;;  %s747_s12 = scalar_lea.sflag [#allocation5], %s746_s14 }
 0x2d0   : > { %p1108_p9 = pnand %p1746_p5, %p1745_p3 }
 0x2d2   : > { %1334 = dma.done.wait (!%p1108_p9), %s747_s12, 16  }
 0x2d3   : > { %1336 = vsyncadd (!%p1108_p9), %s747_s12, 4294967280  ;;  %s22_s23 = sadd.s32 1, %s1359_s23   ;;  %s1747_s18 = smov %s1343_s19 }
 0x2d4   : > { %p19_p2 = scmp.ge.s32.totalorder %s22_s23, 4   ;;  %s1748_s19 = smov %s1347_s20 }
 0x2d5   : > { %s1749_s20 = smov %s1550_s17  ;;  %s1750_s21 = smov %s1355_s22 }
 0x2d6   : > { %s1751_s22 = smov %s1753_s8  ;;  %21 = sbr.rel (!%p19_p2) target bundleno = 7 (0x7), region = 101 }
 0x2dd   :  { %751 = vsyncpa [#allocation4], 1 }
 0x2de   :  { %753 = vsyncpa [#allocation4 + $0x1], 1 }
 0x2df   :  { %754 = vsyncpa [#allocation7], 1 }
 0x2e0   :  { %755 = vsyncpa [#allocation5], 1 }
 0x2e1   :  { %757 = vsyncpa [#allocation5 + $0x1], 1 }

</bundles_post_ra>
